<compile_context>
chip_gen: v6e
topology: v6e:2x2x1
jax: 0.10.0
libtpu: 0.0.40
codegen_flags: <defaults>
</compile_context>

<pallas_src>
import jax
import jax.numpy as jnp
from jax import lax
from jax.experimental import pallas as pl
from jax.experimental.pallas import tpu as pltpu


def _lstm_kernel(x_ref, w_ih_ref, w_hh_ref, b_ref, out_ref, hn_ref, cn_ref):
    """Full-sequence LSTM in one kernel invocation.

    x_ref   : (B*S, I)   batch-major flattened inputs (VMEM resident)
    w_ih_ref: (I, 4H)    W_ih^T
    w_hh_ref: (H, 4H)    W_hh^T   (loop-invariant recurrent weight)
    b_ref   : (1, 4H)    b_ih + b_hh
    out_ref : (B, S, H)  per-step hidden states, written batch-first
    hn_ref  : (B, H)     final hidden state
    cn_ref  : (B, H)     final cell state
    """
    B, S, H = out_ref.shape
    G = 4 * H

    # ---- Hoisted input projection: one MXU matmul for the whole sequence ----
    # pre-gates = X @ W_ih^T + (b_ih + b_hh); bias folded in once here so the
    # per-step recurrence carries no bias add.
    pre2d = jnp.dot(x_ref[...], w_ih_ref[...],
                    preferred_element_type=jnp.float32) + b_ref[...]   # (B*S, 4H)
    # Lane dim (4H) unchanged, sublanes merely regrouped -> cheap reshape.
    pre = pre2d.reshape(B, S, G)

    # Loop-invariant recurrent weight, loaded once outside the loop.
    w_hh = w_hh_ref[...]                                               # (H, 4H)

    # Single-tanh gate activation: sigmoid(x) = 0.5 + 0.5*tanh(0.5*x).
    # The g gate occupies lanes [2H, 3H) and keeps a plain tanh; i/f/o lanes
    # get the sigmoid fixup.  Mask and scales hoisted out of the recurrence.
    lane = lax.broadcasted_iota(jnp.int32, (B, G), 1)
    g_band = (lane >= 2 * H) & (lane < 3 * H)
    scale = jnp.where(g_band, 1.0, 0.5).astype(jnp.float32)    # pre- and post-scale
    offset = jnp.where(g_band, 0.0, 0.5).astype(jnp.float32)

    h = jnp.zeros((B, H), jnp.float32)
    c = jnp.zeros((B, H), jnp.float32)

    # Fully-unrolled static time loop: per-step critical path is
    # h @ W_hh^T (K=H, aligned) -> add pre-gates -> 1 tanh -> VPU -> tanh(c).
    # TODO(synk): if bit-parity with f32 PyTorch across generations matters,
    # pass precision=lax.Precision.HIGHEST; bf16 operands would roughly halve
    # MXU latency on v6e/v7x but may break the 1e-4 tolerance below.
    for t in range(S):
        gates = pre[:, t, :] + jnp.dot(h, w_hh, preferred_element_type=jnp.float32)
        th = jnp.tanh(gates * scale)        # one EUP pass over the whole (B, 4H) tile
        act = th * scale + offset           # tanh on g lanes, sigmoid on i/f/o lanes
        i_g = act[:, 0:H]
        f_g = act[:, H:2 * H]
        g_g = act[:, 2 * H:3 * H]
        o_g = act[:, 3 * H:4 * H]
        c = f_g * c + i_g * g_g
        h = o_g * jnp.tanh(c)
        out_ref[:, t, :] = h.astype(out_ref.dtype)   # static store, off the recurrent chain

    hn_ref[...] = h.astype(hn_ref.dtype)
    cn_ref[...] = c.astype(cn_ref.dtype)


def encoder_forward(x, params):
    """x: (batch, seq, input_size) f32. Returns (lstm_out, (h_n, c_n)) like nn.LSTM(batch_first=True)."""
    w_ih, w_hh, b_ih, b_hh = params              # PyTorch shapes (4H,I),(4H,H),(4H,),(4H,)
    B, S, I = x.shape
    H = w_hh.shape[1]

    # Weight prep (tiny, once per call): (K, 4H) layout so both in-kernel
    # matmuls are plain A @ W with a lane-dense N = 4H.
    w_ih_t = jnp.transpose(w_ih, (1, 0))         # (I, 4H)
    w_hh_t = jnp.transpose(w_hh, (1, 0))         # (H, 4H)
    bias = (b_ih + b_hh).reshape(1, 4 * H)       # (1, 4H), folded into pre-gates once

    # No data transposes: batch-first x goes straight in via a free contiguous
    # reshape; the kernel writes the (B, S, H) output directly.
    x2d = x.reshape(B * S, I)

    # TODO(synk): for long sequences, add a sequence-chunk grid axis marked
    # "arbitrary" (carry h/c in VMEM scratch) once ~ S*B*(I + 5*H)*4 bytes
    # nears the scoped-VMEM budget (defaults ~16 MiB v5e, ~32 MiB v6e/v7x out
    # of 128/128/64 MiB physical); raise vmem_limit_bytes via
    # pltpu.CompilerParams rather than relying on the default scoped limit.
    # TODO(synk): on v7x with large batch, shard a batch grid axis across the
    # two TensorCores (dimension_semantics=("parallel",)); pointless at B=2.
    out, h_n, c_n = pl.pallas_call(
        _lstm_kernel,
        out_shape=(
            jax.ShapeDtypeStruct((B, S, H), x.dtype),
            jax.ShapeDtypeStruct((B, H), x.dtype),
            jax.ShapeDtypeStruct((B, H), x.dtype),
        ),
        in_specs=[
            pl.BlockSpec(memory_space=pltpu.MemorySpace.VMEM),
            pl.BlockSpec(memory_space=pltpu.MemorySpace.VMEM),
            pl.BlockSpec(memory_space=pltpu.MemorySpace.VMEM),
            pl.BlockSpec(memory_space=pltpu.MemorySpace.VMEM),
        ],
        out_specs=(
            pl.BlockSpec(memory_space=pltpu.MemorySpace.VMEM),
            pl.BlockSpec(memory_space=pltpu.MemorySpace.VMEM),
            pl.BlockSpec(memory_space=pltpu.MemorySpace.VMEM),
        ),
    )(x2d, w_ih_t, w_hh_t, bias)

    hidden = (h_n[None, ...], c_n[None, ...])    # (num_layers=1, B, H)
    return out, hidden


def _reference_lstm(x, params):
    """Pure-JAX reference (lax.scan) mirroring PyTorch LSTM semantics."""
    w_ih, w_hh, b_ih, b_hh = params
    B, S, I = x.shape
    H = w_hh.shape[1]

    def step(carry, x_t):
        h, c = carry
        gates = x_t @ w_ih.T + b_ih + h @ w_hh.T + b_hh
        i_g = jax.nn.sigmoid(gates[:, 0 * H:1 * H])
        f_g = jax.nn.sigmoid(gates[:, 1 * H:2 * H])
        g_g = jnp.tanh(gates[:, 2 * H:3 * H])
        o_g = jax.nn.sigmoid(gates[:, 3 * H:4 * H])
        c_new = f_g * c + i_g * g_g
        h_new = o_g * jnp.tanh(c_new)
        return (h_new, c_new), h_new

    init = (jnp.zeros((B, H), x.dtype), jnp.zeros((B, H), x.dtype))
    (h_n, c_n), outs = lax.scan(step, init, jnp.transpose(x, (1, 0, 2)))
    return jnp.transpose(outs, (1, 0, 2)), (h_n[None], c_n[None])


def init_params(key, input_size, hidden_size):
    """Deterministic init matching nn.LSTM parameter shapes: U(-1/sqrt(H), 1/sqrt(H))."""
    k1, k2, k3, k4 = jax.random.split(key, 4)
    bound = 1.0 / jnp.sqrt(hidden_size)
    w_ih = jax.random.uniform(k1, (4 * hidden_size, input_size),
                              minval=-bound, maxval=bound, dtype=jnp.float32)
    w_hh = jax.random.uniform(k2, (4 * hidden_size, hidden_size),
                              minval=-bound, maxval=bound, dtype=jnp.float32)
    b_ih = jax.random.uniform(k3, (4 * hidden_size,),
                              minval=-bound, maxval=bound, dtype=jnp.float32)
    b_hh = jax.random.uniform(k4, (4 * hidden_size,),
                              minval=-bound, maxval=bound, dtype=jnp.float32)
    return (w_ih, w_hh, b_ih, b_hh)


if __name__ == "__main__":
    # Small shapes consistent with the module: batch=2, seq=8, input_size=4, hidden=32.
    # TODO(synk): num_layers > 1 / inter-layer dropout not implemented (module defaults: 1 layer, dropout=0).
    batch, seq, input_size, hidden_size = 2, 8, 4, 32

    key = jax.random.PRNGKey(0)
    kx, kp = jax.random.split(key)
    x = jax.random.normal(kx, (batch, seq, input_size), dtype=jnp.float32)
    params = init_params(kp, input_size, hidden_size)

    fwd = jax.jit(encoder_forward)
    lstm_out, (h_n, c_n) = fwd(x, params)
    jax.block_until_ready((lstm_out, h_n, c_n))

    # Sanity check against pure-JAX reference.
    ref_out, (ref_h, ref_c) = _reference_lstm(x, params)
    assert lstm_out.shape == (batch, seq, hidden_size)
    assert h_n.shape == (1, batch, hidden_size) and c_n.shape == (1, batch, hidden_size)
    assert jnp.allclose(lstm_out, ref_out, atol=1e-4, rtol=1e-4)
    assert jnp.allclose(h_n, ref_h, atol=1e-4, rtol=1e-4)
    assert jnp.allclose(c_n, ref_c, atol=1e-4, rtol=1e-4)

    print("KERNEL_OK")
</pallas_src>

<mosaic_0001>
module attributes {stable_mosaic.version = 11 : i64} {
  func.func @_lstm_kernel(%arg0: memref<16x4xf32, #tpu.memory_space<vmem>>, %arg1: memref<4x128xf32, #tpu.memory_space<vmem>>, %arg2: memref<32x128xf32, #tpu.memory_space<vmem>>, %arg3: memref<1x128xf32, #tpu.memory_space<vmem>>, %arg4: memref<2x8x32xf32, #tpu.memory_space<vmem>>, %arg5: memref<2x32xf32, #tpu.memory_space<vmem>>, %arg6: memref<2x32xf32, #tpu.memory_space<vmem>>) attributes {dimension_semantics = [], scalar_prefetch = 0 : i64, scratch_operands = 0 : i64, tpu.core_type = #tpu.core_type<tc>} {
    %c0 = arith.constant 0 : index
    %c0_0 = arith.constant 0 : index
    %0 = vector.load %arg0[%c0, %c0_0] : memref<16x4xf32, #tpu.memory_space<vmem>>, vector<16x4xf32>
    %c0_1 = arith.constant 0 : index
    %c0_2 = arith.constant 0 : index
    %1 = vector.load %arg1[%c0_1, %c0_2] : memref<4x128xf32, #tpu.memory_space<vmem>>, vector<4x128xf32>
    %cst = arith.constant dense<0.000000e+00> : vector<16x128xf32>
    %2 = tpu.matmul %0, %1, %cst {dimension_numbers = #tpu.dot_dimension_numbers<[1], [0], [0], [1], [0, 0, 1, 1], [], []>} : vector<16x4xf32>, vector<4x128xf32>, vector<16x128xf32> -> vector<16x128xf32>
    %c0_3 = arith.constant 0 : index
    %c0_4 = arith.constant 0 : index
    %3 = vector.load %arg3[%c0_3, %c0_4] : memref<1x128xf32, #tpu.memory_space<vmem>>, vector<1x128xf32>
    %4 = vector.broadcast %3 : vector<1x128xf32> to vector<16x128xf32>
    %5 = arith.addf %2, %4 : vector<16x128xf32>
    %6 = vector.shape_cast %5 : vector<16x128xf32> to vector<2x8x128xf32>
    %c0_5 = arith.constant 0 : index
    %c0_6 = arith.constant 0 : index
    %7 = vector.load %arg2[%c0_5, %c0_6] : memref<32x128xf32, #tpu.memory_space<vmem>>, vector<32x128xf32>
    %8 = tpu.iota {dimensions = array<i32: 1>} : vector<2x128xi32>
    %c64_i32 = arith.constant 64 : i32
    %9 = vector.broadcast %c64_i32 : i32 to vector<2x128xi32>
    %10 = arith.cmpi sge, %8, %9 : vector<2x128xi32>
    %c96_i32 = arith.constant 96 : i32
    %11 = vector.broadcast %c96_i32 : i32 to vector<2x128xi32>
    %12 = arith.cmpi slt, %8, %11 : vector<2x128xi32>
    %13 = arith.andi %10, %12 : vector<2x128xi1>
    %cst_7 = arith.constant 1.000000e+00 : f32
    %cst_8 = arith.constant 5.000000e-01 : f32
    %14 = vector.broadcast %cst_7 : f32 to vector<2x128xf32>
    %15 = vector.broadcast %cst_8 : f32 to vector<2x128xf32>
    %16 = arith.select %13, %14, %15 : vector<2x128xi1>, vector<2x128xf32>
    %cst_9 = arith.constant 0.000000e+00 : f32
    %cst_10 = arith.constant 5.000000e-01 : f32
    %17 = vector.broadcast %cst_9 : f32 to vector<2x128xf32>
    %18 = vector.broadcast %cst_10 : f32 to vector<2x128xf32>
    %19 = arith.select %13, %17, %18 : vector<2x128xi1>, vector<2x128xf32>
    %cst_11 = arith.constant 0.000000e+00 : f32
    %20 = vector.broadcast %cst_11 : f32 to vector<2x32xf32>
    %cst_12 = arith.constant 0.000000e+00 : f32
    %21 = vector.broadcast %cst_12 : f32 to vector<2x32xf32>
    %22 = vector.extract_strided_slice %6 {offsets = [0, 0, 0], sizes = [2, 1, 128], strides = [1, 1, 1]} : vector<2x8x128xf32> to vector<2x1x128xf32>
    %23 = vector.shape_cast %22 : vector<2x1x128xf32> to vector<2x128xf32>
    %cst_13 = arith.constant dense<0.000000e+00> : vector<2x128xf32>
    %24 = tpu.matmul %20, %7, %cst_13 {dimension_numbers = #tpu.dot_dimension_numbers<[1], [0], [0], [1], [0, 0, 1, 1], [], []>} : vector<2x32xf32>, vector<32x128xf32>, vector<2x128xf32> -> vector<2x128xf32>
    %25 = arith.addf %23, %24 : vector<2x128xf32>
    %26 = arith.mulf %25, %16 : vector<2x128xf32>
    %27 = math.tanh %26 : vector<2x128xf32>
    %28 = arith.mulf %27, %16 : vector<2x128xf32>
    %29 = arith.addf %28, %19 : vector<2x128xf32>
    %30 = vector.extract_strided_slice %29 {offsets = [0, 0], sizes = [2, 32], strides = [1, 1]} : vector<2x128xf32> to vector<2x32xf32>
    %31 = vector.extract_strided_slice %29 {offsets = [0, 32], sizes = [2, 32], strides = [1, 1]} : vector<2x128xf32> to vector<2x32xf32>
    %32 = vector.extract_strided_slice %29 {offsets = [0, 64], sizes = [2, 32], strides = [1, 1]} : vector<2x128xf32> to vector<2x32xf32>
    %33 = vector.extract_strided_slice %29 {offsets = [0, 96], sizes = [2, 32], strides = [1, 1]} : vector<2x128xf32> to vector<2x32xf32>
    %34 = arith.mulf %31, %21 : vector<2x32xf32>
    %35 = arith.mulf %30, %32 : vector<2x32xf32>
    %36 = arith.addf %34, %35 : vector<2x32xf32>
    %37 = math.tanh %36 : vector<2x32xf32>
    %38 = arith.mulf %33, %37 : vector<2x32xf32>
    %c0_14 = arith.constant 0 : index
    %c0_15 = arith.constant 0 : index
    %c0_16 = arith.constant 0 : index
    %39 = vector.load %arg4[%c0_14, %c0_15, %c0_16] : memref<2x8x32xf32, #tpu.memory_space<vmem>>, vector<2x1x32xf32>
    %40 = vector.shape_cast %39 : vector<2x1x32xf32> to vector<2x32xf32>
    %41 = vector.shape_cast %38 : vector<2x32xf32> to vector<2x1x32xf32>
    tpu.vector_store %arg4[%c0_14, %c0_15, %c0_16], %41 {strides = array<i32>} : memref<2x8x32xf32, #tpu.memory_space<vmem>>, vector<2x1x32xf32>,
    %42 = vector.extract_strided_slice %6 {offsets = [0, 1, 0], sizes = [2, 1, 128], strides = [1, 1, 1]} : vector<2x8x128xf32> to vector<2x1x128xf32>
    %43 = vector.shape_cast %42 : vector<2x1x128xf32> to vector<2x128xf32>
    %cst_17 = arith.constant dense<0.000000e+00> : vector<2x128xf32>
    %44 = tpu.matmul %38, %7, %cst_17 {dimension_numbers = #tpu.dot_dimension_numbers<[1], [0], [0], [1], [0, 0, 1, 1], [], []>} : vector<2x32xf32>, vector<32x128xf32>, vector<2x128xf32> -> vector<2x128xf32>
    %45 = arith.addf %43, %44 : vector<2x128xf32>
    %46 = arith.mulf %45, %16 : vector<2x128xf32>
    %47 = math.tanh %46 : vector<2x128xf32>
    %48 = arith.mulf %47, %16 : vector<2x128xf32>
    %49 = arith.addf %48, %19 : vector<2x128xf32>
    %50 = vector.extract_strided_slice %49 {offsets = [0, 0], sizes = [2, 32], strides = [1, 1]} : vector<2x128xf32> to vector<2x32xf32>
    %51 = vector.extract_strided_slice %49 {offsets = [0, 32], sizes = [2, 32], strides = [1, 1]} : vector<2x128xf32> to vector<2x32xf32>
    %52 = vector.extract_strided_slice %49 {offsets = [0, 64], sizes = [2, 32], strides = [1, 1]} : vector<2x128xf32> to vector<2x32xf32>
    %53 = vector.extract_strided_slice %49 {offsets = [0, 96], sizes = [2, 32], strides = [1, 1]} : vector<2x128xf32> to vector<2x32xf32>
    %54 = arith.mulf %51, %36 : vector<2x32xf32>
    %55 = arith.mulf %50, %52 : vector<2x32xf32>
    %56 = arith.addf %54, %55 : vector<2x32xf32>
    %57 = math.tanh %56 : vector<2x32xf32>
    %58 = arith.mulf %53, %57 : vector<2x32xf32>
    %c0_18 = arith.constant 0 : index
    %c1 = arith.constant 1 : index
    %c0_19 = arith.constant 0 : index
    %59 = vector.load %arg4[%c0_18, %c1, %c0_19] : memref<2x8x32xf32, #tpu.memory_space<vmem>>, vector<2x1x32xf32>
    %60 = vector.shape_cast %59 : vector<2x1x32xf32> to vector<2x32xf32>
    %61 = vector.shape_cast %58 : vector<2x32xf32> to vector<2x1x32xf32>
    tpu.vector_store %arg4[%c0_18, %c1, %c0_19], %61 {strides = array<i32>} : memref<2x8x32xf32, #tpu.memory_space<vmem>>, vector<2x1x32xf32>,
    %62 = vector.extract_strided_slice %6 {offsets = [0, 2, 0], sizes = [2, 1, 128], strides = [1, 1, 1]} : vector<2x8x128xf32> to vector<2x1x128xf32>
    %63 = vector.shape_cast %62 : vector<2x1x128xf32> to vector<2x128xf32>
    %cst_20 = arith.constant dense<0.000000e+00> : vector<2x128xf32>
    %64 = tpu.matmul %58, %7, %cst_20 {dimension_numbers = #tpu.dot_dimension_numbers<[1], [0], [0], [1], [0, 0, 1, 1], [], []>} : vector<2x32xf32>, vector<32x128xf32>, vector<2x128xf32> -> vector<2x128xf32>
    %65 = arith.addf %63, %64 : vector<2x128xf32>
    %66 = arith.mulf %65, %16 : vector<2x128xf32>
    %67 = math.tanh %66 : vector<2x128xf32>
    %68 = arith.mulf %67, %16 : vector<2x128xf32>
    %69 = arith.addf %68, %19 : vector<2x128xf32>
    %70 = vector.extract_strided_slice %69 {offsets = [0, 0], sizes = [2, 32], strides = [1, 1]} : vector<2x128xf32> to vector<2x32xf32>
    %71 = vector.extract_strided_slice %69 {offsets = [0, 32], sizes = [2, 32], strides = [1, 1]} : vector<2x128xf32> to vector<2x32xf32>
    %72 = vector.extract_strided_slice %69 {offsets = [0, 64], sizes = [2, 32], strides = [1, 1]} : vector<2x128xf32> to vector<2x32xf32>
    %73 = vector.extract_strided_slice %69 {offsets = [0, 96], sizes = [2, 32], strides = [1, 1]} : vector<2x128xf32> to vector<2x32xf32>
    %74 = arith.mulf %71, %56 : vector<2x32xf32>
    %75 = arith.mulf %70, %72 : vector<2x32xf32>
    %76 = arith.addf %74, %75 : vector<2x32xf32>
    %77 = math.tanh %76 : vector<2x32xf32>
    %78 = arith.mulf %73, %77 : vector<2x32xf32>
    %c0_21 = arith.constant 0 : index
    %c2 = arith.constant 2 : index
    %c0_22 = arith.constant 0 : index
    %79 = vector.load %arg4[%c0_21, %c2, %c0_22] : memref<2x8x32xf32, #tpu.memory_space<vmem>>, vector<2x1x32xf32>
    %80 = vector.shape_cast %79 : vector<2x1x32xf32> to vector<2x32xf32>
    %81 = vector.shape_cast %78 : vector<2x32xf32> to vector<2x1x32xf32>
    tpu.vector_store %arg4[%c0_21, %c2, %c0_22], %81 {strides = array<i32>} : memref<2x8x32xf32, #tpu.memory_space<vmem>>, vector<2x1x32xf32>,
    %82 = vector.extract_strided_slice %6 {offsets = [0, 3, 0], sizes = [2, 1, 128], strides = [1, 1, 1]} : vector<2x8x128xf32> to vector<2x1x128xf32>
    %83 = vector.shape_cast %82 : vector<2x1x128xf32> to vector<2x128xf32>
    %cst_23 = arith.constant dense<0.000000e+00> : vector<2x128xf32>
    %84 = tpu.matmul %78, %7, %cst_23 {dimension_numbers = #tpu.dot_dimension_numbers<[1], [0], [0], [1], [0, 0, 1, 1], [], []>} : vector<2x32xf32>, vector<32x128xf32>, vector<2x128xf32> -> vector<2x128xf32>
    %85 = arith.addf %83, %84 : vector<2x128xf32>
    %86 = arith.mulf %85, %16 : vector<2x128xf32>
    %87 = math.tanh %86 : vector<2x128xf32>
    %88 = arith.mulf %87, %16 : vector<2x128xf32>
    %89 = arith.addf %88, %19 : vector<2x128xf32>
    %90 = vector.extract_strided_slice %89 {offsets = [0, 0], sizes = [2, 32], strides = [1, 1]} : vector<2x128xf32> to vector<2x32xf32>
    %91 = vector.extract_strided_slice %89 {offsets = [0, 32], sizes = [2, 32], strides = [1, 1]} : vector<2x128xf32> to vector<2x32xf32>
    %92 = vector.extract_strided_slice %89 {offsets = [0, 64], sizes = [2, 32], strides = [1, 1]} : vector<2x128xf32> to vector<2x32xf32>
    %93 = vector.extract_strided_slice %89 {offsets = [0, 96], sizes = [2, 32], strides = [1, 1]} : vector<2x128xf32> to vector<2x32xf32>
    %94 = arith.mulf %91, %76 : vector<2x32xf32>
    %95 = arith.mulf %90, %92 : vector<2x32xf32>
    %96 = arith.addf %94, %95 : vector<2x32xf32>
    %97 = math.tanh %96 : vector<2x32xf32>
    %98 = arith.mulf %93, %97 : vector<2x32xf32>
    %c0_24 = arith.constant 0 : index
    %c3 = arith.constant 3 : index
    %c0_25 = arith.constant 0 : index
    %99 = vector.load %arg4[%c0_24, %c3, %c0_25] : memref<2x8x32xf32, #tpu.memory_space<vmem>>, vector<2x1x32xf32>
    %100 = vector.shape_cast %99 : vector<2x1x32xf32> to vector<2x32xf32>
    %101 = vector.shape_cast %98 : vector<2x32xf32> to vector<2x1x32xf32>
    tpu.vector_store %arg4[%c0_24, %c3, %c0_25], %101 {strides = array<i32>} : memref<2x8x32xf32, #tpu.memory_space<vmem>>, vector<2x1x32xf32>,
    %102 = vector.extract_strided_slice %6 {offsets = [0, 4, 0], sizes = [2, 1, 128], strides = [1, 1, 1]} : vector<2x8x128xf32> to vector<2x1x128xf32>
    %103 = vector.shape_cast %102 : vector<2x1x128xf32> to vector<2x128xf32>
    %cst_26 = arith.constant dense<0.000000e+00> : vector<2x128xf32>
    %104 = tpu.matmul %98, %7, %cst_26 {dimension_numbers = #tpu.dot_dimension_numbers<[1], [0], [0], [1], [0, 0, 1, 1], [], []>} : vector<2x32xf32>, vector<32x128xf32>, vector<2x128xf32> -> vector<2x128xf32>
    %105 = arith.addf %103, %104 : vector<2x128xf32>
    %106 = arith.mulf %105, %16 : vector<2x128xf32>
    %107 = math.tanh %106 : vector<2x128xf32>
    %108 = arith.mulf %107, %16 : vector<2x128xf32>
    %109 = arith.addf %108, %19 : vector<2x128xf32>
    %110 = vector.extract_strided_slice %109 {offsets = [0, 0], sizes = [2, 32], strides = [1, 1]} : vector<2x128xf32> to vector<2x32xf32>
    %111 = vector.extract_strided_slice %109 {offsets = [0, 32], sizes = [2, 32], strides = [1, 1]} : vector<2x128xf32> to vector<2x32xf32>
    %112 = vector.extract_strided_slice %109 {offsets = [0, 64], sizes = [2, 32], strides = [1, 1]} : vector<2x128xf32> to vector<2x32xf32>
    %113 = vector.extract_strided_slice %109 {offsets = [0, 96], sizes = [2, 32], strides = [1, 1]} : vector<2x128xf32> to vector<2x32xf32>
    %114 = arith.mulf %111, %96 : vector<2x32xf32>
    %115 = arith.mulf %110, %112 : vector<2x32xf32>
    %116 = arith.addf %114, %115 : vector<2x32xf32>
    %117 = math.tanh %116 : vector<2x32xf32>
    %118 = arith.mulf %113, %117 : vector<2x32xf32>
    %c0_27 = arith.constant 0 : index
    %c4 = arith.constant 4 : index
    %c0_28 = arith.constant 0 : index
    %119 = vector.load %arg4[%c0_27, %c4, %c0_28] : memref<2x8x32xf32, #tpu.memory_space<vmem>>, vector<2x1x32xf32>
    %120 = vector.shape_cast %119 : vector<2x1x32xf32> to vector<2x32xf32>
    %121 = vector.shape_cast %118 : vector<2x32xf32> to vector<2x1x32xf32>
    tpu.vector_store %arg4[%c0_27, %c4, %c0_28], %121 {strides = array<i32>} : memref<2x8x32xf32, #tpu.memory_space<vmem>>, vector<2x1x32xf32>,
    %122 = vector.extract_strided_slice %6 {offsets = [0, 5, 0], sizes = [2, 1, 128], strides = [1, 1, 1]} : vector<2x8x128xf32> to vector<2x1x128xf32>
    %123 = vector.shape_cast %122 : vector<2x1x128xf32> to vector<2x128xf32>
    %cst_29 = arith.constant dense<0.000000e+00> : vector<2x128xf32>
    %124 = tpu.matmul %118, %7, %cst_29 {dimension_numbers = #tpu.dot_dimension_numbers<[1], [0], [0], [1], [0, 0, 1, 1], [], []>} : vector<2x32xf32>, vector<32x128xf32>, vector<2x128xf32> -> vector<2x128xf32>
    %125 = arith.addf %123, %124 : vector<2x128xf32>
    %126 = arith.mulf %125, %16 : vector<2x128xf32>
    %127 = math.tanh %126 : vector<2x128xf32>
    %128 = arith.mulf %127, %16 : vector<2x128xf32>
    %129 = arith.addf %128, %19 : vector<2x128xf32>
    %130 = vector.extract_strided_slice %129 {offsets = [0, 0], sizes = [2, 32], strides = [1, 1]} : vector<2x128xf32> to vector<2x32xf32>
    %131 = vector.extract_strided_slice %129 {offsets = [0, 32], sizes = [2, 32], strides = [1, 1]} : vector<2x128xf32> to vector<2x32xf32>
    %132 = vector.extract_strided_slice %129 {offsets = [0, 64], sizes = [2, 32], strides = [1, 1]} : vector<2x128xf32> to vector<2x32xf32>
    %133 = vector.extract_strided_slice %129 {offsets = [0, 96], sizes = [2, 32], strides = [1, 1]} : vector<2x128xf32> to vector<2x32xf32>
    %134 = arith.mulf %131, %116 : vector<2x32xf32>
    %135 = arith.mulf %130, %132 : vector<2x32xf32>
    %136 = arith.addf %134, %135 : vector<2x32xf32>
    %137 = math.tanh %136 : vector<2x32xf32>
    %138 = arith.mulf %133, %137 : vector<2x32xf32>
    %c0_30 = arith.constant 0 : index
    %c5 = arith.constant 5 : index
    %c0_31 = arith.constant 0 : index
    %139 = vector.load %arg4[%c0_30, %c5, %c0_31] : memref<2x8x32xf32, #tpu.memory_space<vmem>>, vector<2x1x32xf32>
    %140 = vector.shape_cast %139 : vector<2x1x32xf32> to vector<2x32xf32>
    %141 = vector.shape_cast %138 : vector<2x32xf32> to vector<2x1x32xf32>
    tpu.vector_store %arg4[%c0_30, %c5, %c0_31], %141 {strides = array<i32>} : memref<2x8x32xf32, #tpu.memory_space<vmem>>, vector<2x1x32xf32>,
    %142 = vector.extract_strided_slice %6 {offsets = [0, 6, 0], sizes = [2, 1, 128], strides = [1, 1, 1]} : vector<2x8x128xf32> to vector<2x1x128xf32>
    %143 = vector.shape_cast %142 : vector<2x1x128xf32> to vector<2x128xf32>
    %cst_32 = arith.constant dense<0.000000e+00> : vector<2x128xf32>
    %144 = tpu.matmul %138, %7, %cst_32 {dimension_numbers = #tpu.dot_dimension_numbers<[1], [0], [0], [1], [0, 0, 1, 1], [], []>} : vector<2x32xf32>, vector<32x128xf32>, vector<2x128xf32> -> vector<2x128xf32>
    %145 = arith.addf %143, %144 : vector<2x128xf32>
    %146 = arith.mulf %145, %16 : vector<2x128xf32>
    %147 = math.tanh %146 : vector<2x128xf32>
    %148 = arith.mulf %147, %16 : vector<2x128xf32>
    %149 = arith.addf %148, %19 : vector<2x128xf32>
    %150 = vector.extract_strided_slice %149 {offsets = [0, 0], sizes = [2, 32], strides = [1, 1]} : vector<2x128xf32> to vector<2x32xf32>
    %151 = vector.extract_strided_slice %149 {offsets = [0, 32], sizes = [2, 32], strides = [1, 1]} : vector<2x128xf32> to vector<2x32xf32>
    %152 = vector.extract_strided_slice %149 {offsets = [0, 64], sizes = [2, 32], strides = [1, 1]} : vector<2x128xf32> to vector<2x32xf32>
    %153 = vector.extract_strided_slice %149 {offsets = [0, 96], sizes = [2, 32], strides = [1, 1]} : vector<2x128xf32> to vector<2x32xf32>
    %154 = arith.mulf %151, %136 : vector<2x32xf32>
    %155 = arith.mulf %150, %152 : vector<2x32xf32>
    %156 = arith.addf %154, %155 : vector<2x32xf32>
    %157 = math.tanh %156 : vector<2x32xf32>
    %158 = arith.mulf %153, %157 : vector<2x32xf32>
    %c0_33 = arith.constant 0 : index
    %c6 = arith.constant 6 : index
    %c0_34 = arith.constant 0 : index
    %159 = vector.load %arg4[%c0_33, %c6, %c0_34] : memref<2x8x32xf32, #tpu.memory_space<vmem>>, vector<2x1x32xf32>
    %160 = vector.shape_cast %159 : vector<2x1x32xf32> to vector<2x32xf32>
    %161 = vector.shape_cast %158 : vector<2x32xf32> to vector<2x1x32xf32>
    tpu.vector_store %arg4[%c0_33, %c6, %c0_34], %161 {strides = array<i32>} : memref<2x8x32xf32, #tpu.memory_space<vmem>>, vector<2x1x32xf32>,
    %162 = vector.extract_strided_slice %6 {offsets = [0, 7, 0], sizes = [2, 1, 128], strides = [1, 1, 1]} : vector<2x8x128xf32> to vector<2x1x128xf32>
    %163 = vector.shape_cast %162 : vector<2x1x128xf32> to vector<2x128xf32>
    %cst_35 = arith.constant dense<0.000000e+00> : vector<2x128xf32>
    %164 = tpu.matmul %158, %7, %cst_35 {dimension_numbers = #tpu.dot_dimension_numbers<[1], [0], [0], [1], [0, 0, 1, 1], [], []>} : vector<2x32xf32>, vector<32x128xf32>, vector<2x128xf32> -> vector<2x128xf32>
    %165 = arith.addf %163, %164 : vector<2x128xf32>
    %166 = arith.mulf %165, %16 : vector<2x128xf32>
    %167 = math.tanh %166 : vector<2x128xf32>
    %168 = arith.mulf %167, %16 : vector<2x128xf32>
    %169 = arith.addf %168, %19 : vector<2x128xf32>
    %170 = vector.extract_strided_slice %169 {offsets = [0, 0], sizes = [2, 32], strides = [1, 1]} : vector<2x128xf32> to vector<2x32xf32>
    %171 = vector.extract_strided_slice %169 {offsets = [0, 32], sizes = [2, 32], strides = [1, 1]} : vector<2x128xf32> to vector<2x32xf32>
    %172 = vector.extract_strided_slice %169 {offsets = [0, 64], sizes = [2, 32], strides = [1, 1]} : vector<2x128xf32> to vector<2x32xf32>
    %173 = vector.extract_strided_slice %169 {offsets = [0, 96], sizes = [2, 32], strides = [1, 1]} : vector<2x128xf32> to vector<2x32xf32>
    %174 = arith.mulf %171, %156 : vector<2x32xf32>
    %175 = arith.mulf %170, %172 : vector<2x32xf32>
    %176 = arith.addf %174, %175 : vector<2x32xf32>
    %177 = math.tanh %176 : vector<2x32xf32>
    %178 = arith.mulf %173, %177 : vector<2x32xf32>
    %c0_36 = arith.constant 0 : index
    %c7 = arith.constant 7 : index
    %c0_37 = arith.constant 0 : index
    %179 = vector.load %arg4[%c0_36, %c7, %c0_37] : memref<2x8x32xf32, #tpu.memory_space<vmem>>, vector<2x1x32xf32>
    %180 = vector.shape_cast %179 : vector<2x1x32xf32> to vector<2x32xf32>
    %181 = vector.shape_cast %178 : vector<2x32xf32> to vector<2x1x32xf32>
    tpu.vector_store %arg4[%c0_36, %c7, %c0_37], %181 {strides = array<i32>} : memref<2x8x32xf32, #tpu.memory_space<vmem>>, vector<2x1x32xf32>,
    %c0_38 = arith.constant 0 : index
    %c0_39 = arith.constant 0 : index
    %182 = vector.load %arg5[%c0_38, %c0_39] : memref<2x32xf32, #tpu.memory_space<vmem>>, vector<2x32xf32>
    tpu.vector_store %arg5[%c0_38, %c0_39], %178 {strides = array<i32>} : memref<2x32xf32, #tpu.memory_space<vmem>>, vector<2x32xf32>,
    %c0_40 = arith.constant 0 : index
    %c0_41 = arith.constant 0 : index
    %183 = vector.load %arg6[%c0_40, %c0_41] : memref<2x32xf32, #tpu.memory_space<vmem>>, vector<2x32xf32>
    tpu.vector_store %arg6[%c0_40, %c0_41], %176 {strides = array<i32>} : memref<2x32xf32, #tpu.memory_space<vmem>>, vector<2x32xf32>,
    return
  }
}

</mosaic_0001>

<bundles_post_ra>
// kernel: encoder_forward.1
= control target key start
LH: loop header
LB: loop body
LE: loop exit
PB: predicated region body
PF: predicated region fallthrough
CT: control target
= control target key end

     0   :  { %12 = vsyncpa [#allocation3], 0  ;;  %vm39_vm0 = vcmask 1043456   ;;  %v1607_v3 = vmov 0.0   ;;  %vm32_vm1 = vcmask 31744   ;;  %s1997_s0 = inlined_call_operand.vmem [shape: f32[16,4], index: 0, kind: input, shape index: {}]   ;;  %s1998_s1 = inlined_call_operand.vmem [shape: f32[4,128], index: 1, kind: input, shape index: {}]   ;;  %s1999_s2 = inlined_call_operand.vmem [shape: f32[32,128], index: 2, kind: input, shape index: {}]   ;;  %s2000_s3 = inlined_call_operand.vmem [shape: f32[1,128], index: 3, kind: input, shape index: {}]   ;;  %s2001_s4 = inlined_call_operand.hbm [shape: f32[2,8,32], index: 4, kind: output, shape index: {0}]   ;;  %s2002_s5 = inlined_call_operand.hbm [shape: f32[2,32], index: 5, kind: output, shape index: {1}]   ;;  %s2003_s6 = inlined_call_operand.hbm [shape: f32[2,32], index: 6, kind: output, shape index: {2}]  }
   0x1   :  { %v1656_v0 = vld [vmem:[%s1999_s2 + $0x18] sm:$0xff]  ;;  %v24_v1 = vld [vmem:[%s1998_s1] sm:$0xf]  ;;  %1380 = vmatprep.subr.mxu1 %v1607_v3  ;;  %v1668_v4 = vld [vmem:[%s1999_s2 + $0x10] sm:$0xff] }
   0x2   :  { %v22_v2 = vld [vmem:[%s1997_s0] sm:$0xff]  ;;  %1375 = vmatprep.subr.msk.mxu0 %vm39_vm0, %v24_v1  ;;  %v23_v5 = vld [vmem:[%s1997_s0 + $0x8] sm:$0xff]  ;;  %1381 = vmatpush3.msra.mxu1 %v1656_v0 }
   0x3   :  { %1376 = vmatpush3.msk.msra.mxu0 %vm39_vm0, %v24_v1 }
   0x4   :  { %13 = vsyncpa [#allocation5], 0  ;;  %1382 = vmatprep.subr.mxu1 %v1607_v3  ;;  %1377 = vmatprep.mubr.msk.f32.mxu0 %vm32_vm1, %v22_v2  ;;  %v1678_v6 = vld [vmem:[%s1999_s2 + $0x8] sm:$0xff]  ;;  %v1685_v7 = vld [vmem:[%s1999_s2] sm:$0xff]  ;;  %vm1608_vm2 = vmmov 0   ;;  %v122_v8 = vlaneseq  ;;  %v1609_v16 = vmov 0.5  }
   0x5   :  { %1383 = vmatpush3.msra.mxu1 %v1668_v4  ;;  %1378 = vmatmul.mubr.msk.f32.vlgmr.msra.gmra.mxu0 %vm32_vm1, %v23_v5  ;;  %v1321_v11 = vld [vmem:[%s2000_s3] ss:$0 sm:$0xff]  ;;  %s1610_s3 = smov 64   ;;  %s1611_s10 = smov 32   ;;  %vm263_vm6 = vcmask 1041409   ;;  %vm129_vm7 = vcmask 261120  }
   0x6   :  { %1384 = vmatprep.subr.mxu1 %v1607_v3  ;;  %1388 = vmatprep.mubr.msk.f32.mxu1 %vm1608_vm2, %v1607_v3  ;;  %v123_v9 = vand.u32 127, %v122_v8  ;;  %vm259_vm8 = vcmask 253952   ;;  %vm401_vm9 = vcmask 254977   ;;  %s1612_s11 = smov 96   ;;  %vm543_vm10 = vcmask 256002   ;;  %s1613_s12 = smov [#allocation4]  }
   0x7   :  { %1385 = vmatpush3.msra.mxu1 %v1678_v6  ;;  %1391 = vmatprep.subr.mxu0 %v1607_v3  ;;  %vm686_vm11 = vcmask 257027   ;;  %vm829_vm12 = vcmask 258052   ;;  %vm972_vm13 = vcmask 259077   ;;  %vm1115_vm14 = vcmask 260102   ;;  %s1296_s13 = sshll.u32 %s1613_s12, 4  ;;  %s1614_s14 = smov [#allocation2]   ;;  %s1297_s13 = int_to_ptr.vmem [resolvable:$true] %s1296_s13 }
   0x8   :  { %1386 = vmatprep.subr.mxu1 %v1607_v3  ;;  %1392 = vmatpush3.msra.mxu0 %v1656_v0  ;;  %vm124_vm3 = vcmp.ge.s32.totalorder %v123_v9, 64  ;;  %vm125_vm4 = vcmp.lt.s32.totalorder %v123_v9, 96  ;;  %vm1258_vm15 = vcmask 261127   ;;  %s1283_s15 = sshll.u32 %s1614_s14, 4  ;;  %s1615_s16 = smov [#allocation6]   ;;  %s1284_s15 = int_to_ptr.vmem [resolvable:$true] %s1283_s15 }
   0x9   :  { %1387 = vmatpush3.msra.mxu1 %v1685_v7  ;;  %1393 = vmatprep.subr.mxu0 %v1607_v3  ;;  %vm1718_vm5 = vmand %vm124_vm3, %vm125_vm4  ;;  %s1306_s17 = sshll.u32 %s1615_s16, 4  ;;  %s1543_s18 = scalar_lea.vmem %s1297_s13, 32  ;;  %s1307_s17 = int_to_ptr.vmem [resolvable:$true] %s1306_s17 }
   0xa   :  { %1389 = vmatmul.mubr.f32.vlgmr.msra.gmra.mxu1 %v1607_v3  ;;  %1394 = vmatpush3.msra.mxu0 %v1668_v4  ;;  %v1728_v17 = vsel %vm1718_vm5, 1.0, %v1609_v16  ;;  %v1737_v28 = vsel %vm1718_vm5, 0.0, %v1609_v16  ;;  %p1544_p0 = scmp.ne.s32.totalorder %s1297_s13, %s1543_s18  ;;  %p1548_p1 = scmp.lt.s32.totalorder %s1297_s13, %s1297_s13 }
   0xb   :  { %1395 = vmatprep.subr.mxu0 %v1607_v3  ;;  %1399 = vmatprep.mubr.msk.f32.mxu0 %vm1608_vm2, %v1607_v3  ;;  %p1549_p2 = scmp.lt.s32.totalorder %s1543_s18, %s1543_s18 }
   0xc   :  { %1396 = vmatpush3.msra.mxu0 %v1678_v6  ;;  %1402 = vmatprep.subr.mxu1 %v1607_v3 }
   0xd   :  { %1397 = vmatprep.subr.mxu0 %v1607_v3  ;;  %1403 = vmatpush3.msra.mxu1 %v1656_v0  ;;  %p1550_p3 = por %p1549_p2, %p1548_p1 }
   0xe   :  { %1398 = vmatpush3.msra.mxu0 %v1685_v7  ;;  %1404 = vmatprep.subr.mxu1 %v1607_v3 }
   0xf   :  { %1405 = vmatpush3.msra.mxu1 %v1668_v4  ;;  %1410 = vmatprep.mubr.msk.f32.mxu1 %vm1608_vm2, %v1607_v3  ;;  %p1551_p4 = pnand %p1550_p3, %p1544_p0 }
  0x10   :  { %1406 = vmatprep.subr.mxu1 %v1607_v3  ;;  %1413 = vmatprep.subr.mxu0 %v1607_v3 }
  0x11   :  { %1407 = vmatpush3.msra.mxu1 %v1678_v6 }
  0x12   :  { %1408 = vmatprep.subr.mxu1 %v1607_v3 }
  0x13   :  { %1409 = vmatpush3.msra.mxu1 %v1685_v7 }
  0x14   :  { %1424 = vmatprep.subr.mxu1 %v1607_v3 }
  0xc5   :  { %v1379_v10 = vpop.f32.mrf.mxu0 }
  0xc6   :  { %v1724_v15 = vadd.f32 %v1379_v10, %v1321_v11 }
  0xc7   :  { %v109_v12 = vpop.f32.mrf.mxu0 }
  0xc8   :  { %v1722_v14 = vadd.f32 %v1321_v11, %v109_v12 }
  0xca   :  { %v199_v18 = vpop.f32.mrf.mxu1 }
  0xcb   :  { %v204_v19 = vrot.slane %v199_v18, 1  ;;  %v207_v20 = vadd.f32 %v199_v18, %v1722_v14 }
  0xcc   :  { %v1390_v21 = vpop.f32.mrf.mxu1 }
  0xcd   :  { %v208_v22 = vadd.f32 %v204_v19, %v1724_v15  ;;  %v209_v23 = vmul.f32 %v207_v20, %v1728_v17 }
  0xcf   :  { %v210_v24 = vmul.f32 %v208_v22, %v1728_v17  ;;  %1479 = vtanh.f32 %v209_v23 }
  0xd1   :  { %1481 = vtanh.f32 %v210_v24 }
  0xdc   :  { %v1480_v25 = vpop.eup %1479 }
  0xdd   :  { %v213_v30 = vmul.f32 %v1480_v25, %v1728_v17 }
  0xde   :  { %v1482_v26 = vpop.eup %1481 }
  0xdf   :  { %v214_v27 = vmul.f32 %v1482_v26, %v1728_v17  ;;  %v215_v31 = vadd.f32 %v213_v30, %v1737_v28 }
  0xe1   :  { %v216_v29 = vadd.f32 %v214_v27, %v1737_v28  ;;  %v217_v39 = vmul.f32 0.0, %v215_v31 }
  0xe3   :  { %223 = vrot.lane.b32.xlu0 %v216_v29, %s1610_s3  ;;  %v218_v36 = vmul.f32 0.0, %v216_v29 }
  0xe7   :  { %221 = vrot.lane.b32.xlu0 %v215_v31, %s1610_s3 }
 0x155   :  { %v224_v32 = vpop.permute.xlu0 %223 }
 0x156   :  { %v228_v33 = vmul.f32 %v224_v32, %v216_v29 }
 0x158   :  { %233 = vrot.lane.b32.xlu1 %v228_v33, %s1611_s10 }
 0x159   :  { %v222_v34 = vpop.permute.xlu0 %221 }
 0x15a   :  { %v227_v35 = vmul.f32 %v222_v34, %v215_v31 }
 0x15c   :  { %231 = vrot.lane.b32.xlu1 %v227_v35, %s1611_s10 }
 0x1ca   :  { %v234_v37 = vpop.permute.xlu1 %233 }
 0x1cb   :  { %v238_v38 = vadd.f32 %v234_v37, %v218_v36 }
 0x1cd   :  { %1483 = vtanh.f32 %v238_v38  ;;  %v356_v9 = vrot.slane %v238_v38, 7 }
 0x1ce   :  { %v232_v40 = vpop.permute.xlu1 %231 }
 0x1cf   :  { %v237_v41 = vadd.f32 %v232_v40, %v217_v39 }
 0x1d1   :  { %1485 = vtanh.f32 %v237_v41  ;;  %v355_v10 = vrot.slane %v237_v41, 7 }
 0x1da   :  { %v1484_v42 = vpop.eup %1483 }
 0x1db   :  { %245 = vrot.lane.b32.xlu0 %v1484_v42, %s1610_s3 }
 0x1de   :  { %v1486_v43 = vpop.eup %1485 }
 0x1df   :  { %243 = vrot.lane.b32.xlu1 %v1486_v43, %s1610_s3 }
 0x24d   :  { %v246_v44 = vpop.permute.xlu0 %245 }
 0x24e   :  { %v1748_v45 = vmul.f32 %v246_v44, %v216_v29 }
 0x250   :  { %v262_v47 = vrot.slane %v1748_v45, 7 }
 0x251   :  { %v244_v46 = vpop.permute.xlu1 %243 }
 0x252   :  { %v1751_v48 = vmul.f32 %v244_v46, %v215_v31 }
 0x254   :  { %v264_v49 = vsel %vm263_vm6, %v262_v47, %v1751_v48 }
 0x255   :  { %265 = vrot.lane.b32.xlu0 %v264_v49, %s1611_s10 }
 0x2c7   :  { %v266_v50 = vpop.permute.xlu0 %265 }
 0x2c8   :  { %1400 = vmatmul.mubr.msk.f32.vlgmr.msra.gmra.mxu0 %vm129_vm7, %v266_v50 }
 0x2c9   :  { %1414 = vmatpush3.msra.mxu0 %v1656_v0  ;;  %1421 = vmatprep.mubr.msk.f32.mxu0 %vm1608_vm2, %v1607_v3 }
 0x2ca   :  { %1415 = vmatprep.subr.mxu0 %v1607_v3 }
 0x2cb   :  { %1416 = vmatpush3.msra.mxu0 %v1668_v4 }
 0x2cc   :  { %1417 = vmatprep.subr.mxu0 %v1607_v3 }
 0x2cd   :  { %1418 = vmatpush3.msra.mxu0 %v1678_v6 }
 0x2ce   :  { %1419 = vmatprep.subr.mxu0 %v1607_v3 }
 0x2cf   :  { %1420 = vmatpush3.msra.mxu0 %v1685_v7 }
 0x2d0   :  { %1435 = vmatprep.subr.mxu0 %v1607_v3 }
 0x388   :  { %v335_v51 = vpop.f32.mrf.mxu0 }
 0x389   :  { %v340_v52 = vrot.slane %v335_v51, 7  ;;  %v344_v53 = vadd.f32 %v335_v51, %v1724_v15 }
 0x38a   :  { %v1401_v54 = vpop.f32.mrf.mxu0 }
 0x38b   :  { %v343_v55 = vadd.f32 %v340_v52, %v1722_v14  ;;  %v346_v56 = vmul.f32 %v344_v53, %v1728_v17 }
 0x38d   :  { %v345_v57 = vmul.f32 %v343_v55, %v1728_v17  ;;  %1487 = vtanh.f32 %v346_v56 }
 0x38f   :  { %1489 = vtanh.f32 %v345_v57 }
 0x39a   :  { %v1488_v58 = vpop.eup %1487 }
 0x39b   :  { %v350_v59 = vmul.f32 %v1488_v58, %v1728_v17 }
 0x39c   :  { %v1490_v60 = vpop.eup %1489 }
 0x39d   :  { %v352_v61 = vadd.f32 %v350_v59, %v1737_v28  ;;  %v349_v62 = vmul.f32 %v1490_v60, %v1728_v17 }
 0x39f   :  { %365 = vrot.lane.b32.xlu0 %v352_v61, %s1610_s3  ;;  %v351_v63 = vadd.f32 %v349_v62, %v1737_v28  ;;  %v360_v11 = vmul.f32 %v356_v9, %v352_v61 }
 0x3a1   :  { %363 = vrot.lane.b32.xlu1 %v351_v63, %s1610_s3  ;;  %v359_v16 = vmul.f32 %v355_v10, %v351_v63 }
 0x411   :  { %v366_v1 = vpop.permute.xlu0 %365 }
 0x412   :  { %v370_v2 = vmul.f32 %v366_v1, %v352_v61 }
 0x413   :  { %v364_v5 = vpop.permute.xlu1 %363 }
 0x414   :  { %v369_v8 = vmul.f32 %v364_v5, %v351_v63  ;;  %375 = vrot.lane.b32.xlu0 %v370_v2, %s1611_s10 }
 0x416   :  { %373 = vrot.lane.b32.xlu1 %v369_v8, %s1611_s10 }
 0x486   :  { %v376_v12 = vpop.permute.xlu0 %375 }
 0x487   :  { %v380_v13 = vadd.f32 %v376_v12, %v360_v11 }
 0x488   :  { %v374_v18 = vpop.permute.xlu1 %373 }
 0x489   :  { %1491 = vtanh.f32 %v380_v13  ;;  %v379_v19 = vadd.f32 %v374_v18, %v359_v16  ;;  %v498_v51 = vrot.slane %v380_v13, 7 }
 0x48b   :  { %1493 = vtanh.f32 %v379_v19  ;;  %v497_v50 = vrot.slane %v379_v19, 7 }
 0x496   :  { %v1492_v20 = vpop.eup %1491 }
 0x497   :  { %387 = vrot.lane.b32.xlu0 %v1492_v20, %s1610_s3 }
 0x498   :  { %v1494_v21 = vpop.eup %1493 }
 0x499   :  { %385 = vrot.lane.b32.xlu1 %v1494_v21, %s1610_s3 }
 0x509   :  { %v388_v22 = vpop.permute.xlu0 %387 }
 0x50a   :  { %v1783_v25 = vmul.f32 %v388_v22, %v352_v61 }
 0x50b   :  { %v386_v23 = vpop.permute.xlu1 %385 }
 0x50c   :  { %v1781_v24 = vmul.f32 %v386_v23, %v351_v63 }
 0x50e   :  { %v404_v26 = vrot.slane %v1781_v24, 1 }
 0x510   :  { %v405_v27 = vsel %vm263_vm6, %v1783_v25, %v404_v26 }
 0x511   :  { %406 = vrot.lane.b32.xlu1 %v405_v27, %s1611_s10 }
 0x583   :  { %v407_v29 = vpop.permute.xlu1 %406 }
 0x584   :  { %1411 = vmatmul.mubr.msk.f32.vlgmr.msra.gmra.mxu1 %vm129_vm7, %v407_v29 }
 0x585   :  { %1425 = vmatpush3.msra.mxu1 %v1656_v0  ;;  %1432 = vmatprep.mubr.msk.f32.mxu1 %vm1608_vm2, %v1607_v3 }
 0x586   :  { %1426 = vmatprep.subr.mxu1 %v1607_v3 }
 0x587   :  { %1427 = vmatpush3.msra.mxu1 %v1668_v4 }
 0x588   :  { %1428 = vmatprep.subr.mxu1 %v1607_v3 }
 0x589   :  { %1429 = vmatpush3.msra.mxu1 %v1678_v6 }
 0x58a   :  { %1430 = vmatprep.subr.mxu1 %v1607_v3 }
 0x58b   :  { %1431 = vmatpush3.msra.mxu1 %v1685_v7 }
 0x58c   :  { %1446 = vmatprep.subr.mxu1 %v1607_v3 }
 0x644   :  { %v476_v30 = vpop.f32.mrf.mxu1 }
 0x645   :  { %v481_v31 = vrot.slane %v476_v30, 6  ;;  %v482_v32 = vrot.slane %v476_v30, 7 }
 0x646   :  { %v1412_v33 = vpop.f32.mrf.mxu1 }
 0x647   :  { %v485_v34 = vadd.f32 %v481_v31, %v1722_v14  ;;  %v486_v35 = vadd.f32 %v482_v32, %v1724_v15 }
 0x649   :  { %v487_v36 = vmul.f32 %v485_v34, %v1728_v17  ;;  %v488_v37 = vmul.f32 %v486_v35, %v1728_v17 }
 0x64b   :  { %1495 = vtanh.f32 %v487_v36 }
 0x64c   :  { %1497 = vtanh.f32 %v488_v37 }
 0x658   :  { %v1496_v38 = vpop.eup %1495 }
 0x659   :  { %v1498_v39 = vpop.eup %1497  ;;  %v491_v40 = vmul.f32 %v1496_v38, %v1728_v17 }
 0x65a   :  { %v492_v41 = vmul.f32 %v1498_v39, %v1728_v17 }
 0x65b   :  { %v493_v42 = vadd.f32 %v491_v40, %v1737_v28 }
 0x65c   :  { %v494_v43 = vadd.f32 %v492_v41, %v1737_v28 }
 0x65d   :  { %505 = vrot.lane.b32.xlu0 %v493_v42, %s1610_s3  ;;  %v501_v52 = vmul.f32 %v497_v50, %v493_v42 }
 0x65e   :  { %507 = vrot.lane.b32.xlu1 %v494_v43, %s1610_s3  ;;  %v502_v53 = vmul.f32 %v498_v51, %v494_v43 }
 0x6cf   :  { %v506_v44 = vpop.permute.xlu0 %505 }
 0x6d0   :  { %v508_v46 = vpop.permute.xlu1 %507  ;;  %v511_v47 = vmul.f32 %v506_v44, %v493_v42 }
 0x6d1   :  { %v512_v49 = vmul.f32 %v508_v46, %v494_v43 }
 0x6d2   :  { %515 = vrot.lane.b32.xlu0 %v511_v47, %s1611_s10 }
 0x6d3   :  { %517 = vrot.lane.b32.xlu1 %v512_v49, %s1611_s10 }
 0x744   :  { %v516_v54 = vpop.permute.xlu0 %515 }
 0x745   :  { %v518_v55 = vpop.permute.xlu1 %517  ;;  %v521_v56 = vadd.f32 %v516_v54, %v501_v52 }
 0x746   :  { %v522_v57 = vadd.f32 %v518_v55, %v502_v53 }
 0x747   :  { %1499 = vtanh.f32 %v521_v56  ;;  %v640_v33 = vrot.slane %v521_v56, 7 }
 0x748   :  { %1501 = vtanh.f32 %v522_v57  ;;  %v641_v34 = vrot.slane %v522_v57, 7 }
 0x754   :  { %v1500_v58 = vpop.eup %1499 }
 0x755   :  { %v1502_v59 = vpop.eup %1501  ;;  %527 = vrot.lane.b32.xlu0 %v1500_v58, %s1610_s3 }
 0x756   :  { %529 = vrot.lane.b32.xlu1 %v1502_v59, %s1610_s3 }
 0x7c7   :  { %v528_v60 = vpop.permute.xlu0 %527 }
 0x7c8   :  { %v530_v61 = vpop.permute.xlu1 %529  ;;  %v1814_v62 = vmul.f32 %v528_v60, %v493_v42 }
 0x7c9   :  { %v1816_v63 = vmul.f32 %v530_v61, %v494_v43 }
 0x7ca   :  { %v546_v1 = vrot.slane %v1814_v62, 2 }
 0x7cb   :  { %v547_v2 = vrot.slane %v1816_v63, 1 }
 0x7cd   :  { %v548_v5 = vsel %vm263_vm6, %v547_v2, %v546_v1 }
 0x7ce   :  { %549 = vrot.lane.b32.xlu0 %v548_v5, %s1611_s10 }
 0x840   :  { %v550_v8 = vpop.permute.xlu0 %549 }
 0x841   :  { %1422 = vmatmul.mubr.msk.f32.vlgmr.msra.gmra.mxu0 %vm129_vm7, %v550_v8 }
 0x842   :  { %1436 = vmatpush3.msra.mxu0 %v1656_v0  ;;  %1443 = vmatprep.mubr.msk.f32.mxu0 %vm1608_vm2, %v1607_v3 }
 0x843   :  { %1437 = vmatprep.subr.mxu0 %v1607_v3 }
 0x844   :  { %1438 = vmatpush3.msra.mxu0 %v1668_v4 }
 0x845   :  { %1439 = vmatprep.subr.mxu0 %v1607_v3 }
 0x846   :  { %1440 = vmatpush3.msra.mxu0 %v1678_v6 }
 0x847   :  { %1441 = vmatprep.subr.mxu0 %v1607_v3 }
 0x848   :  { %1442 = vmatpush3.msra.mxu0 %v1685_v7 }
 0x849   :  { %1457 = vmatprep.subr.mxu0 %v1607_v3 }
 0x901   :  { %v619_v9 = vpop.f32.mrf.mxu0 }
 0x902   :  { %v624_v10 = vrot.slane %v619_v9, 5  ;;  %v625_v11 = vrot.slane %v619_v9, 6 }
 0x903   :  { %v1423_v12 = vpop.f32.mrf.mxu0 }
 0x904   :  { %v628_v13 = vadd.f32 %v624_v10, %v1722_v14  ;;  %v629_v16 = vadd.f32 %v625_v11, %v1724_v15 }
 0x906   :  { %v630_v18 = vmul.f32 %v628_v13, %v1728_v17  ;;  %v631_v19 = vmul.f32 %v629_v16, %v1728_v17 }
 0x908   :  { %1503 = vtanh.f32 %v630_v18 }
 0x909   :  { %1505 = vtanh.f32 %v631_v19 }
 0x915   :  { %v1504_v20 = vpop.eup %1503 }
 0x916   :  { %v1506_v21 = vpop.eup %1505  ;;  %v634_v22 = vmul.f32 %v1504_v20, %v1728_v17 }
 0x917   :  { %v635_v23 = vmul.f32 %v1506_v21, %v1728_v17 }
 0x918   :  { %v636_v26 = vadd.f32 %v634_v22, %v1737_v28 }
 0x919   :  { %v637_v27 = vadd.f32 %v635_v23, %v1737_v28 }
 0x91a   :  { %648 = vrot.lane.b32.xlu1 %v636_v26, %s1610_s3  ;;  %v644_v35 = vmul.f32 %v640_v33, %v636_v26 }
 0x91b   :  { %650 = vrot.lane.b32.xlu0 %v637_v27, %s1610_s3  ;;  %v645_v36 = vmul.f32 %v641_v34, %v637_v27 }
 0x98c   :  { %v649_v29 = vpop.permute.xlu1 %648 }
 0x98d   :  { %v651_v30 = vpop.permute.xlu0 %650  ;;  %v654_v31 = vmul.f32 %v649_v29, %v636_v26 }
 0x98e   :  { %v655_v32 = vmul.f32 %v651_v30, %v637_v27 }
 0x98f   :  { %658 = vrot.lane.b32.xlu1 %v654_v31, %s1611_s10 }
 0x990   :  { %660 = vrot.lane.b32.xlu0 %v655_v32, %s1611_s10 }
 0xa01   :  { %v659_v37 = vpop.permute.xlu1 %658 }
 0xa02   :  { %v661_v38 = vpop.permute.xlu0 %660  ;;  %v664_v39 = vadd.f32 %v659_v37, %v644_v35 }
 0xa03   :  { %v665_v40 = vadd.f32 %v661_v38, %v645_v36 }
 0xa04   :  { %1507 = vtanh.f32 %v664_v39  ;;  %v783_v16 = vrot.slane %v664_v39, 7 }
 0xa05   :  { %1509 = vtanh.f32 %v665_v40  ;;  %v784_v18 = vrot.slane %v665_v40, 7 }
 0xa11   :  { %v1508_v41 = vpop.eup %1507 }
 0xa12   :  { %v1510_v42 = vpop.eup %1509  ;;  %670 = vrot.lane.b32.xlu1 %v1508_v41, %s1610_s3 }
 0xa13   :  { %672 = vrot.lane.b32.xlu0 %v1510_v42, %s1610_s3 }
 0xa84   :  { %v671_v43 = vpop.permute.xlu1 %670 }
 0xa85   :  { %v673_v44 = vpop.permute.xlu0 %672  ;;  %v1847_v46 = vmul.f32 %v671_v43, %v636_v26 }
 0xa86   :  { %v1849_v47 = vmul.f32 %v673_v44, %v637_v27 }
 0xa87   :  { %v689_v49 = vrot.slane %v1847_v46, 3 }
 0xa88   :  { %v690_v50 = vrot.slane %v1849_v47, 2 }
 0xa8a   :  { %v691_v51 = vsel %vm263_vm6, %v690_v50, %v689_v49 }
 0xa8b   :  { %692 = vrot.lane.b32.xlu1 %v691_v51, %s1611_s10 }
 0xafd   :  { %v693_v52 = vpop.permute.xlu1 %692 }
 0xafe   :  { %1433 = vmatmul.mubr.msk.f32.vlgmr.msra.gmra.mxu1 %vm129_vm7, %v693_v52 }
 0xaff   :  { %1447 = vmatpush3.msra.mxu1 %v1656_v0  ;;  %1454 = vmatprep.mubr.msk.f32.mxu1 %vm1608_vm2, %v1607_v3 }
 0xb00   :  { %1448 = vmatprep.subr.mxu1 %v1607_v3 }
 0xb01   :  { %1449 = vmatpush3.msra.mxu1 %v1668_v4 }
 0xb02   :  { %1450 = vmatprep.subr.mxu1 %v1607_v3 }
 0xb03   :  { %1451 = vmatpush3.msra.mxu1 %v1678_v6 }
 0xb04   :  { %1452 = vmatprep.subr.mxu1 %v1607_v3 }
 0xb05   :  { %1453 = vmatpush3.msra.mxu1 %v1685_v7 }
 0xbbe   :  { %v762_v53 = vpop.f32.mrf.mxu1 }
 0xbbf   :  { %v767_v54 = vrot.slane %v762_v53, 4  ;;  %v768_v55 = vrot.slane %v762_v53, 5 }
 0xbc0   :  { %v1434_v56 = vpop.f32.mrf.mxu1 }
 0xbc1   :  { %v771_v57 = vadd.f32 %v767_v54, %v1722_v14  ;;  %v772_v58 = vadd.f32 %v768_v55, %v1724_v15 }
 0xbc3   :  { %v773_v59 = vmul.f32 %v771_v57, %v1728_v17  ;;  %v774_v60 = vmul.f32 %v772_v58, %v1728_v17 }
 0xbc5   :  { %1511 = vtanh.f32 %v773_v59 }
 0xbc6   :  { %1513 = vtanh.f32 %v774_v60 }
 0xbd2   :  { %v1512_v61 = vpop.eup %1511 }
 0xbd3   :  { %v1514_v1 = vpop.eup %1513  ;;  %v777_v2 = vmul.f32 %v1512_v61, %v1728_v17 }
 0xbd4   :  { %v778_v5 = vmul.f32 %v1514_v1, %v1728_v17 }
 0xbd5   :  { %v779_v8 = vadd.f32 %v777_v2, %v1737_v28 }
 0xbd6   :  { %v780_v9 = vadd.f32 %v778_v5, %v1737_v28 }
 0xbd7   :  { %791 = vrot.lane.b32.xlu0 %v779_v8, %s1610_s3  ;;  %v787_v19 = vmul.f32 %v783_v16, %v779_v8 }
 0xbd8   :  { %793 = vrot.lane.b32.xlu1 %v780_v9, %s1610_s3  ;;  %v788_v20 = vmul.f32 %v784_v18, %v780_v9 }
 0xc49   :  { %v792_v10 = vpop.permute.xlu0 %791 }
 0xc4a   :  { %v794_v11 = vpop.permute.xlu1 %793  ;;  %v797_v12 = vmul.f32 %v792_v10, %v779_v8 }
 0xc4b   :  { %v798_v13 = vmul.f32 %v794_v11, %v780_v9 }
 0xc4c   :  { %801 = vrot.lane.b32.xlu0 %v797_v12, %s1611_s10 }
 0xc4d   :  { %803 = vrot.lane.b32.xlu1 %v798_v13, %s1611_s10 }
 0xcbe   :  { %v802_v21 = vpop.permute.xlu0 %801 }
 0xcbf   :  { %v804_v22 = vpop.permute.xlu1 %803  ;;  %v807_v23 = vadd.f32 %v802_v21, %v787_v19 }
 0xcc0   :  { %v808_v26 = vadd.f32 %v804_v22, %v788_v20 }
 0xcc1   :  { %1515 = vtanh.f32 %v807_v23  ;;  %v926_v55 = vrot.slane %v807_v23, 7 }
 0xcc2   :  { %1517 = vtanh.f32 %v808_v26  ;;  %v927_v56 = vrot.slane %v808_v26, 7 }
 0xcce   :  { %v1516_v27 = vpop.eup %1515 }
 0xccf   :  { %v1518_v29 = vpop.eup %1517  ;;  %813 = vrot.lane.b32.xlu0 %v1516_v27, %s1610_s3 }
 0xcd0   :  { %815 = vrot.lane.b32.xlu1 %v1518_v29, %s1610_s3 }
 0xd41   :  { %v814_v30 = vpop.permute.xlu0 %813 }
 0xd42   :  { %v816_v31 = vpop.permute.xlu1 %815  ;;  %v1879_v32 = vmul.f32 %v814_v30, %v779_v8 }
 0xd43   :  { %v1881_v33 = vmul.f32 %v816_v31, %v780_v9 }
 0xd44   :  { %v832_v34 = vrot.slane %v1879_v32, 4 }
 0xd45   :  { %v833_v35 = vrot.slane %v1881_v33, 3 }
 0xd47   :  { %v834_v36 = vsel %vm263_vm6, %v833_v35, %v832_v34 }
 0xd48   :  { %835 = vrot.lane.b32.xlu0 %v834_v36, %s1611_s10 }
 0xdba   :  { %v836_v37 = vpop.permute.xlu0 %835 }
 0xdbb   :  { %1444 = vmatmul.mubr.msk.f32.vlgmr.msra.gmra.mxu0 %vm129_vm7, %v836_v37 }
 0xdbc   :  { %1458 = vmatpush3.msra.mxu0 %v1656_v0  ;;  %1465 = vmatprep.mubr.msk.f32.mxu0 %vm1608_vm2, %v1607_v3 }
 0xdbd   :  { %1459 = vmatprep.subr.mxu0 %v1607_v3 }
 0xdbe   :  { %1460 = vmatpush3.msra.mxu0 %v1668_v4 }
 0xdbf   :  { %1461 = vmatprep.subr.mxu0 %v1607_v3 }
 0xdc0   :  { %1462 = vmatpush3.msra.mxu0 %v1678_v6 }
 0xdc1   :  { %1463 = vmatprep.subr.mxu0 %v1607_v3 }
 0xdc2   :  { %1464 = vmatpush3.msra.mxu0 %v1685_v7 }
 0xe7b   :  { %v905_v38 = vpop.f32.mrf.mxu0 }
 0xe7c   :  { %v910_v39 = vrot.slane %v905_v38, 3  ;;  %v911_v40 = vrot.slane %v905_v38, 4 }
 0xe7d   :  { %v1445_v41 = vpop.f32.mrf.mxu0 }
 0xe7e   :  { %v914_v0 = vadd.f32 %v910_v39, %v1722_v14  ;;  %v915_v42 = vadd.f32 %v911_v40, %v1724_v15 }
 0xe80   :  { %v916_v43 = vmul.f32 %v914_v0, %v1728_v17  ;;  %v917_v4 = vmul.f32 %v915_v42, %v1728_v17 }
 0xe82   :  { %1519 = vtanh.f32 %v916_v43 }
 0xe83   :  { %1521 = vtanh.f32 %v917_v4 }
 0xe8f   :  { %v1520_v44 = vpop.eup %1519 }
 0xe90   :  { %v1522_v6 = vpop.eup %1521  ;;  %v920_v3 = vmul.f32 %v1520_v44, %v1728_v17 }
 0xe91   :  { %v921_v7 = vmul.f32 %v1522_v6, %v1728_v17 }
 0xe92   :  { %v922_v49 = vadd.f32 %v920_v3, %v1737_v28 }
 0xe93   :  { %v923_v50 = vadd.f32 %v921_v7, %v1737_v28 }
 0xe94   :  { %934 = vrot.lane.b32.xlu1 %v922_v49, %s1610_s3  ;;  %v930_v57 = vmul.f32 %v926_v55, %v922_v49 }
 0xe95   :  { %936 = vrot.lane.b32.xlu0 %v923_v50, %s1610_s3  ;;  %v931_v58 = vmul.f32 %v927_v56, %v923_v50 }
 0xf06   :  { %v935_v51 = vpop.permute.xlu1 %934 }
 0xf07   :  { %v937_v52 = vpop.permute.xlu0 %936  ;;  %v940_v53 = vmul.f32 %v935_v51, %v922_v49 }
 0xf08   :  { %v941_v54 = vmul.f32 %v937_v52, %v923_v50 }
 0xf09   :  { %944 = vrot.lane.b32.xlu1 %v940_v53, %s1611_s10 }
 0xf0a   :  { %946 = vrot.lane.b32.xlu0 %v941_v54, %s1611_s10 }
 0xf7b   :  { %v945_v59 = vpop.permute.xlu1 %944 }
 0xf7c   :  { %v947_v60 = vpop.permute.xlu0 %946  ;;  %v950_v61 = vadd.f32 %v945_v59, %v930_v57 }
 0xf7d   :  { %v951_v1 = vadd.f32 %v947_v60, %v931_v58 }
 0xf7e   :  { %1523 = vtanh.f32 %v950_v61  ;;  %v1069_v0 = vrot.slane %v950_v61, 7 }
 0xf7f   :  { %1525 = vtanh.f32 %v951_v1  ;;  %v1070_v42 = vrot.slane %v951_v1, 7 }
 0xf8b   :  { %v1524_v2 = vpop.eup %1523 }
 0xf8c   :  { %v1526_v5 = vpop.eup %1525  ;;  %956 = vrot.lane.b32.xlu1 %v1524_v2, %s1610_s3 }
 0xf8d   :  { %958 = vrot.lane.b32.xlu0 %v1526_v5, %s1610_s3 }
 0xffe   :  { %v957_v8 = vpop.permute.xlu1 %956 }
 0xfff   :  { %v959_v9 = vpop.permute.xlu0 %958  ;;  %v1911_v10 = vmul.f32 %v957_v8, %v922_v49 }
0x1000   :  { %v1913_v11 = vmul.f32 %v959_v9, %v923_v50 }
0x1001   :  { %v975_v12 = vrot.slane %v1911_v10, 5 }
0x1002   :  { %v976_v13 = vrot.slane %v1913_v11, 4 }
0x1004   :  { %v977_v16 = vsel %vm263_vm6, %v976_v13, %v975_v12 }
0x1005   :  { %978 = vrot.lane.b32.xlu1 %v977_v16, %s1611_s10 }
0x1077   :  { %v979_v18 = vpop.permute.xlu1 %978 }
0x1078   :  { %1455 = vmatmul.mubr.msk.f32.vlgmr.msra.gmra.mxu1 %vm129_vm7, %v979_v18 }
0x1138   :  { %v1048_v19 = vpop.f32.mrf.mxu1 }
0x1139   :  { %v1053_v20 = vrot.slane %v1048_v19, 2  ;;  %v1054_v21 = vrot.slane %v1048_v19, 3 }
0x113a   :  { %v1456_v22 = vpop.f32.mrf.mxu1 }
0x113b   :  { %v1057_v23 = vadd.f32 %v1053_v20, %v1722_v14  ;;  %v1058_v26 = vadd.f32 %v1054_v21, %v1724_v15 }
0x113d   :  { %v1059_v27 = vmul.f32 %v1057_v23, %v1728_v17  ;;  %v1060_v29 = vmul.f32 %v1058_v26, %v1728_v17 }
0x113f   :  { %1527 = vtanh.f32 %v1059_v27 }
0x1140   :  { %1529 = vtanh.f32 %v1060_v29 }
0x114c   :  { %v1528_v30 = vpop.eup %1527 }
0x114d   :  { %v1530_v31 = vpop.eup %1529  ;;  %v1063_v34 = vmul.f32 %v1528_v30, %v1728_v17 }
0x114e   :  { %v1064_v35 = vmul.f32 %v1530_v31, %v1728_v17 }
0x114f   :  { %v1065_v36 = vadd.f32 %v1063_v34, %v1737_v28 }
0x1150   :  { %v1066_v37 = vadd.f32 %v1064_v35, %v1737_v28 }
0x1151   :  { %1077 = vrot.lane.b32.xlu0 %v1065_v36, %s1610_s3  ;;  %v1073_v43 = vmul.f32 %v1069_v0, %v1065_v36 }
0x1152   :  { %1079 = vrot.lane.b32.xlu1 %v1066_v37, %s1610_s3  ;;  %v1074_v4 = vmul.f32 %v1070_v42, %v1066_v37 }
0x11c3   :  { %v1078_v38 = vpop.permute.xlu0 %1077 }
0x11c4   :  { %v1080_v39 = vpop.permute.xlu1 %1079  ;;  %v1083_v40 = vmul.f32 %v1078_v38, %v1065_v36 }
0x11c5   :  { %v1084_v41 = vmul.f32 %v1080_v39, %v1066_v37 }
0x11c6   :  { %1087 = vrot.lane.b32.xlu0 %v1083_v40, %s1611_s10 }
0x11c7   :  { %1089 = vrot.lane.b32.xlu1 %v1084_v41, %s1611_s10 }
0x1238   :  { %v1088_v44 = vpop.permute.xlu0 %1087 }
0x1239   :  { %v1090_v6 = vpop.permute.xlu1 %1089  ;;  %v1093_v3 = vadd.f32 %v1088_v44, %v1073_v43 }
0x123a   :  { %v1094_v7 = vadd.f32 %v1090_v6, %v1074_v4 }
0x123b   :  { %1531 = vtanh.f32 %v1093_v3  ;;  %v1212_v23 = vrot.slane %v1093_v3, 7 }
0x123c   :  { %1533 = vtanh.f32 %v1094_v7  ;;  %v1213_v26 = vrot.slane %v1094_v7, 7 }
0x1248   :  { %v1532_v49 = vpop.eup %1531 }
0x1249   :  { %v1534_v50 = vpop.eup %1533  ;;  %1099 = vrot.lane.b32.xlu0 %v1532_v49, %s1610_s3 }
0x124a   :  { %1101 = vrot.lane.b32.xlu1 %v1534_v50, %s1610_s3 }
0x12bb   :  { %v1100_v51 = vpop.permute.xlu0 %1099 }
0x12bc   :  { %v1102_v52 = vpop.permute.xlu1 %1101  ;;  %v1105_v53 = vmul.f32 %v1100_v51, %v1065_v36 }
0x12bd   :  { %v1106_v54 = vmul.f32 %v1102_v52, %v1066_v37 }
0x12be   :  { %v1118_v55 = vrot.slane %v1105_v53, 6 }
0x12bf   :  { %v1119_v56 = vrot.slane %v1106_v54, 5 }
0x12c1   :  { %v1120_v57 = vsel %vm263_vm6, %v1119_v56, %v1118_v55 }
0x12c2   :  { %1121 = vrot.lane.b32.xlu0 %v1120_v57, %s1611_s10 }
0x1334   :  { %v1122_v58 = vpop.permute.xlu0 %1121 }
0x1335   :  { %1466 = vmatmul.mubr.msk.f32.vlgmr.msra.gmra.mxu0 %vm129_vm7, %v1122_v58 }
0x13f5   :  { %v1191_v59 = vpop.f32.mrf.mxu0 }
0x13f6   :  { %v1196_v60 = vrot.slane %v1191_v59, 1  ;;  %v1197_v61 = vrot.slane %v1191_v59, 2 }
0x13f7   :  { %v1467_v1 = vpop.f32.mrf.mxu0 }
0x13f8   :  { %v1200_v2 = vadd.f32 %v1196_v60, %v1722_v14  ;;  %v1201_v5 = vadd.f32 %v1197_v61, %v1724_v15 }
0x13fa   :  { %v1202_v8 = vmul.f32 %v1200_v2, %v1728_v17  ;;  %v1203_v9 = vmul.f32 %v1201_v5, %v1728_v17 }
0x13fc   :  { %1535 = vtanh.f32 %v1202_v8 }
0x13fd   :  { %1537 = vtanh.f32 %v1203_v9 }
0x1409   :  { %v1536_v12 = vpop.eup %1535 }
0x140a   :  { %v1538_v13 = vpop.eup %1537  ;;  %v1206_v16 = vmul.f32 %v1536_v12, %v1728_v17 }
0x140b   :  { %v1207_v18 = vmul.f32 %v1538_v13, %v1728_v17 }
0x140c   :  { %v1208_v19 = vadd.f32 %v1206_v16, %v1737_v28 }
0x140d   :  { %v1209_v20 = vadd.f32 %v1207_v18, %v1737_v28 }
0x140e   :  { %1220 = vrot.lane.b32.xlu0 %v1208_v19, %s1610_s3  ;;  %v1216_v27 = vmul.f32 %v1212_v23, %v1208_v19 }
0x140f   :  { %1222 = vrot.lane.b32.xlu1 %v1209_v20, %s1610_s3  ;;  %v1217_v17 = vmul.f32 %v1213_v26, %v1209_v20 }
0x1480   :  { %v1221_v14 = vpop.permute.xlu0 %1220 }
0x1481   :  { %v1223_v15 = vpop.permute.xlu1 %1222  ;;  %v1226_v21 = vmul.f32 %v1221_v14, %v1208_v19 }
0x1482   :  { %v1227_v22 = vmul.f32 %v1223_v15, %v1209_v20 }
0x1483   :  { %1230 = vrot.lane.b32.xlu0 %v1226_v21, %s1611_s10 }
0x1484   :  { %1232 = vrot.lane.b32.xlu1 %v1227_v22, %s1611_s10 }
0x14f5   :  { %v1231_v29 = vpop.permute.xlu0 %1230 }
0x14f6   :  { %v1233_v30 = vpop.permute.xlu1 %1232  ;;  %v1236_v31 = vadd.f32 %v1231_v29, %v1216_v27 }
0x14f7   :  { %v1237_v28 = vadd.f32 %v1233_v30, %v1217_v17 }
0x14f8   :  { %1539 = vtanh.f32 %v1236_v31 }
0x14f9   :  { %1541 = vtanh.f32 %v1237_v28 }
0x1505   :  { %v1540_v34 = vpop.eup %1539 }
0x1506   :  { %v1542_v35 = vpop.eup %1541  ;;  %1242 = vrot.lane.b32.xlu0 %v1540_v34, %s1610_s3 }
0x1507   :  { %1244 = vrot.lane.b32.xlu1 %v1542_v35, %s1610_s3 }
0x150a   :  { %255 = vrot.lane.b32.xlu0 %v1748_v45, %s1611_s10 }
0x150b   :  { %253 = vrot.lane.b32.xlu1 %v1751_v48, %s1611_s10 }
0x150e   :  { %397 = vrot.lane.b32.xlu0 %v1783_v25, %s1611_s10 }
0x150f   :  { %395 = vrot.lane.b32.xlu1 %v1781_v24, %s1611_s10 }
0x1512   :  { %539 = vrot.lane.b32.xlu0 %v1816_v63, %s1611_s10 }
0x1513   :  { %537 = vrot.lane.b32.xlu1 %v1814_v62, %s1611_s10 }
0x1516   :  { %682 = vrot.lane.b32.xlu0 %v1849_v47, %s1611_s10 }
0x1517   :  { %680 = vrot.lane.b32.xlu1 %v1847_v46, %s1611_s10 }
0x151a   :  { %825 = vrot.lane.b32.xlu0 %v1881_v33, %s1611_s10 }
0x151b   :  { %823 = vrot.lane.b32.xlu1 %v1879_v32, %s1611_s10  ;;  %v1269_v32 = vrot.slane %v1237_v28, 7 }
0x151e   :  { %968 = vrot.lane.b32.xlu0 %v1913_v11, %s1611_s10 }
0x151f   :  { %966 = vrot.lane.b32.xlu1 %v1911_v10, %s1611_s10 }
0x1522   :  { %1111 = vrot.lane.b32.xlu0 %v1106_v54, %s1611_s10 }
0x1523   :  { %1109 = vrot.lane.b32.xlu1 %v1105_v53, %s1611_s10 }
0x1578   :  { %v1243_v45 = vpop.permute.xlu0 %1242 }
0x1579   :  { %v1245_v48 = vpop.permute.xlu1 %1244  ;;  %v1248_v24 = vmul.f32 %v1243_v45, %v1208_v19 }
0x157a   :  { %v1249_v25 = vmul.f32 %v1245_v48, %v1209_v20 }
0x157b   :  { %1252 = vrot.lane.b32.xlu1 %v1248_v24, %s1611_s10 }
0x157c   :  { %v1261_v62 = vrot.slane %v1249_v25, 7  ;;  %v256_v63 = vpop.permute.xlu0 %255 }
0x157d   :  { %v254_v46 = vpop.permute.xlu1 %253  ;;  %261 = vst.msk [vmem:[#allocation2 + $0x8] sm:$0x1] %vm259_vm8, %v256_v63 }
0x157e   :  { %260 = vst.msk [vmem:[#allocation2] sm:$0x1] %vm259_vm8, %v254_v46  ;;  %1262 = vrot.lane.b32.xlu0 %v1261_v62, %s1611_s10 }
0x157f   :  { %1254 = vrot.lane.b32.xlu1 %v1249_v25, %s1611_s10 }
0x1580   :  { %v398_v47 = vpop.permute.xlu0 %397 }
0x1581   :  { %v396_v33 = vpop.permute.xlu1 %395  ;;  %403 = vst.msk [vmem:[#allocation2 + $0x8] sm:$0x2] %vm401_vm9, %v398_v47 }
0x1582   :  { %402 = vst.msk [vmem:[#allocation2] sm:$0x2] %vm401_vm9, %v396_v33  ;;  %1270 = vrot.lane.b32.xlu0 %v1236_v31, %s1612_s11 }
0x1583   :  { %1272 = vrot.lane.b32.xlu1 %v1269_v32, %s1612_s11 }
0x1584   :  { %v540_v10 = vpop.permute.xlu0 %539 }
0x1585   :  { %v538_v11 = vpop.permute.xlu1 %537  ;;  %545 = vst.msk [vmem:[#allocation2 + $0x8] sm:$0x4] %vm543_vm10, %v540_v10 }
0x1586   :  { %544 = vst.msk [vmem:[#allocation2] sm:$0x4] %vm543_vm10, %v538_v11 }
0x1588   :  { %v683_v36 = vpop.permute.xlu0 %682 }
0x1589   :  { %v681_v37 = vpop.permute.xlu1 %680  ;;  %688 = vst.msk [vmem:[#allocation2 + $0x8] sm:$0x8] %vm686_vm11, %v683_v36 }
0x158a   :  { %687 = vst.msk [vmem:[#allocation2] sm:$0x8] %vm686_vm11, %v681_v37 }
0x158c   :  { %v826_v38 = vpop.permute.xlu0 %825 }
0x158d   :  { %v824_v39 = vpop.permute.xlu1 %823  ;;  %831 = vst.msk [vmem:[#allocation2 + $0x8] sm:$0x10] %vm829_vm12, %v826_v38 }
0x158e   :  { %830 = vst.msk [vmem:[#allocation2] sm:$0x10] %vm829_vm12, %v824_v39 }
0x1590   :  { %v969_v40 = vpop.permute.xlu0 %968 }
0x1591   :  { %v967_v41 = vpop.permute.xlu1 %966  ;;  %974 = vst.msk [vmem:[#allocation2 + $0x8] sm:$0x20] %vm972_vm13, %v969_v40 }
0x1592   :  { %973 = vst.msk [vmem:[#allocation2] sm:$0x20] %vm972_vm13, %v967_v41 }
0x1594   :  { %v1112_v0 = vpop.permute.xlu0 %1111 }
0x1595   :  { %v1110_v42 = vpop.permute.xlu1 %1109  ;;  %1117 = vst.msk [vmem:[#allocation2 + $0x8] sm:$0x40] %vm1115_vm14, %v1112_v0 }
0x1596   :  { %1116 = vst.msk [vmem:[#allocation2] sm:$0x40] %vm1115_vm14, %v1110_v42 }
0x15ed   :  { %v1253_v43 = vpop.permute.xlu1 %1252 }
0x15ee   :  { %1259 = vst.msk [vmem:[#allocation2] sm:$0x80] %vm1258_vm15, %v1253_v43  ;;  %1265 = vst.msk [vmem:[#allocation4 - $0x7] sm:$0x80] %vm1258_vm15, %v1253_v43 }
0x15f0   :  { %v1263_v4 = vpop.permute.xlu0 %1262 }
0x15f1   :  { %1266 = vst.msk [vmem:[#allocation4 + $0x1] sm:$0x1] %vm259_vm8, %v1263_v4  ;;  %v1255_v44 = vpop.permute.xlu1 %1254 }
0x15f2   :  { %1260 = vst.msk [vmem:[#allocation2 + $0x8] sm:$0x80] %vm1258_vm15, %v1255_v44 }
0x15f3   :  { %1554 = shalt.err (!%p1551_p4)
}
0x15f4   :  { %1299 = dma.vmem_to_hbm [thread:$0]  %s1297_s13, 32, %s2002_s5, [#allocation5]  }
0x15f5   :  { %s1563_s21 = scalar_lea.vmem %s1284_s15, 256  ;;  %p1568_p6 = scmp.lt.s32.totalorder %s1284_s15, %s1284_s15 }
0x15f6   :  { %p1564_p5 = scmp.ne.s32.totalorder %s1284_s15, %s1563_s21  ;;  %p1569_p7 = scmp.lt.s32.totalorder %s1563_s21, %s1563_s21 }
0x15f8   :  { %p1570_p8 = por %p1569_p7, %p1568_p6 }
0x15fa   :  { %p1571_p9 = pnand %p1570_p8, %p1564_p5 }
0x15fc   :  { %1574 = shalt.err (!%p1571_p9)
}
0x15fd   :  { %s1616_s22 = smov 128   ;;  %s1617_s23 = smov 8   ;;  %v1271_v6 = vpop.permute.xlu0 %1270  ;;  %v1273_v3 = vpop.permute.xlu1 %1272 }
0x15fe   :  { %1289 = dma.vmem_to_hbm [thread:$0]  %s1284_s15, 256, %s2001_s4, [#allocation3], %s1616_s22, %s1616_s22, %s1617_s23   ;;  %1276 = vst.msk [vmem:[#allocation6 - $0x7] sm:$0x80] %vm1258_vm15, %v1271_v6 }
0x15ff   :  { %1277 = vst.msk [vmem:[#allocation6 + $0x1] sm:$0x1] %vm259_vm8, %v1273_v3  ;;  %s1583_s5 = scalar_lea.vmem %s1307_s17, 32  ;;  %p1588_p11 = scmp.lt.s32.totalorder %s1307_s17, %s1307_s17 }
0x1600   :  { %p1584_p10 = scmp.ne.s32.totalorder %s1307_s17, %s1583_s5  ;;  %p1589_p12 = scmp.lt.s32.totalorder %s1583_s5, %s1583_s5 }
0x1602   :  { %p1590_p13 = por %p1589_p12, %p1588_p11 }
0x1604   :  { %p1591_p0 = pnand %p1590_p13, %p1584_p10 }
0x1606   :  { %1594 = shalt.err (!%p1591_p0)
}
0x1607   :  { %1309 = dma.vmem_to_hbm [thread:$0]  %s1307_s17, 32, %s2003_s6, [#allocation5]  }
0x1608   :  { %1603 = dma.done.wait [#allocation3], 256  }
0x1609   :  { %1604 = vsyncadd [#allocation3], 4294967040 }
0x160a   :  { %1605 = dma.done.wait [#allocation5], 64  }
0x160b   :  { %1606 = vsyncadd [#allocation5], 4294967232 }
0x160c   :  { %1319 = vsyncpa [#allocation3], 1 }
0x160d   :  { %1320 = vsyncpa [#allocation5], 1 }

</bundles_post_ra>
